<compile_context>
chip_gen: v5e
topology: v5e:2x2
jax: 0.10.0
libtpu: 0.0.40
codegen_flags: <defaults>
</compile_context>

<pallas_src>
import functools
import math

import jax
import jax.numpy as jnp
import numpy as np
from jax import lax
from jax.experimental import pallas as pl
from jax.experimental.pallas import tpu as pltpu

LN_EPS = 1e-5
LANE = 128


def _round_up(x, m):
    return (x + m - 1) // m * m


def _layernorm(x, gamma, beta, d_real, d_pad):
    """LayerNorm over the last axis where only the first `d_real` features are
    real data. Padded columns of x are zero by construction and gamma/beta are
    zero-padded, so padded output columns stay zero."""
    inv_d = 1.0 / d_real
    mu = jnp.sum(x, axis=-1, keepdims=True) * inv_d
    diff = x - mu
    # Padded columns contribute (d_pad - d_real) * mu^2 to sum(diff^2); remove it.
    var = (jnp.sum(diff * diff, axis=-1, keepdims=True)
           - float(d_pad - d_real) * (mu * mu)) * inv_d
    return diff * lax.rsqrt(var + LN_EPS) * gamma + beta


def _encoder_layer_kernel(src_ref, pos_ref,
                          wq_ref, wk_ref, wv_ref, bq_ref, bk_ref, bv_ref,
                          wo_ref, bo_ref, w1_ref, b1_ref, w2_ref, b2_ref,
                          g1_ref, be1_ref, g2_ref, be2_ref,
                          out_ref, *, nhead, d_model, head_dim):
    f32 = jnp.float32
    bf16 = jnp.bfloat16

    x = src_ref[0]                       # (S, Dp) f32, zero-padded beyond d_model
    pos = pos_ref[...]                   # (S, Dp) f32
    S, Dp = x.shape
    scale = 1.0 / math.sqrt(head_dim)

    qk_in = (x + pos).astype(bf16)       # pos_embed: q = k = src + pos
    x_b = x.astype(bf16)                 # value path uses src only

    def head_body(h, acc):
        # Per-head projections: (S, Dp) x (Dp, hdp), bf16 in / f32 accumulate.
        q = jnp.dot(qk_in, wq_ref[h], preferred_element_type=f32) + bq_ref[h]
        k = jnp.dot(qk_in, wk_ref[h], preferred_element_type=f32) + bk_ref[h]
        v = jnp.dot(x_b, wv_ref[h], preferred_element_type=f32) + bv_ref[h]
        # Scores contract the last dim of both operands (no in-kernel transpose).
        s = lax.dot_general(q.astype(bf16), k.astype(bf16),
                            dimension_numbers=(((1,), (1,)), ((), ())),
                            preferred_element_type=f32) * scale
        s = s - jnp.max(s, axis=-1, keepdims=True)
        p = jnp.exp(s)
        p = p * pl.reciprocal(jnp.sum(p, axis=-1, keepdims=True), approx=True)
        o = jnp.dot(p.astype(bf16), v.astype(bf16), preferred_element_type=f32)
        # Fold this head's slab of the output projection straight into the
        # accumulator -> no concatenation of head outputs is ever needed.
        return acc + jnp.dot(o.astype(bf16), wo_ref[h], preferred_element_type=f32)

    src2 = lax.fori_loop(0, nhead, head_body, jnp.zeros((S, Dp), f32))
    src2 = src2 + bo_ref[...]

    # residual + norm1   (dropout1 is identity in eval mode)
    y1 = _layernorm(x + src2, g1_ref[...], be1_ref[...], d_model, Dp)

    # FFN: linear2(relu(linear1(y1)))   (dropouts are identity)
    h1 = jnp.dot(y1.astype(bf16), w1_ref[...], preferred_element_type=f32) + b1_ref[...]
    h1 = jnp.maximum(h1, 0.0)
    ff = jnp.dot(h1.astype(bf16), w2_ref[...], preferred_element_type=f32) + b2_ref[...]

    # residual + norm2
    out_ref[0] = _layernorm(y1 + ff, g2_ref[...], be2_ref[...], d_model, Dp)


def transformer_encoder_layer(src_sbd, pos, params, *, nhead):
    """src_sbd: (S, B, D) float32, pos: (S, D) float32  ->  (S, B, D) float32."""
    S, B, D = src_sbd.shape
    F = params["w1"].shape[0]
    assert D % nhead == 0, "d_model must be divisible by nhead"
    hd = D // nhead

    # Lane-dense padded sizes.
    Dp = _round_up(D, LANE)
    Fp = _round_up(F, LANE)
    hdp = _round_up(hd, LANE)

    f32, bf16 = jnp.float32, jnp.bfloat16

    # Activations: (B, S, Dp), feature dim zero-padded to a multiple of 128.
    x = jnp.pad(jnp.transpose(src_sbd, (1, 0, 2)).astype(f32),
                ((0, 0), (0, 0), (0, Dp - D)))
    pos_p = jnp.pad(pos.astype(f32), ((0, 0), (0, Dp - D)))

    wqkv = params["wqkv"]                        # (3D, D), rows [Wq; Wk; Wv]
    bqkv = params["bqkv"].reshape(-1)            # (3D,)

    def split_in_proj(w, b):
        # (D_out, D_in)  ->  (nhead, Dp, hdp)  (in x out, per head), bf16 weights.
        wt = jnp.transpose(w.reshape(nhead, hd, D), (0, 2, 1))       # (H, D, hd)
        wt = jnp.pad(wt, ((0, 0), (0, Dp - D), (0, hdp - hd)))
        bt = jnp.pad(b.reshape(nhead, 1, hd), ((0, 0), (0, 0), (0, hdp - hd)))
        return wt.astype(bf16), bt.astype(f32)

    wq, bq = split_in_proj(wqkv[0:D], bqkv[0:D])
    wk, bk = split_in_proj(wqkv[D:2 * D], bqkv[D:2 * D])
    wv, bv = split_in_proj(wqkv[2 * D:3 * D], bqkv[2 * D:3 * D])

    # Attention out-projection reorganized per head: (nhead, hdp, Dp).
    wo = jnp.transpose(params["wo"].reshape(D, nhead, hd), (1, 2, 0))  # (H, hd, D)
    wo = jnp.pad(wo, ((0, 0), (0, hdp - hd), (0, Dp - D))).astype(bf16)
    bo = jnp.pad(params["bo"].astype(f32), ((0, 0), (0, Dp - D)))

    # FFN weights, pre-transposed to (in, out), zero-padded, bf16.
    w1 = jnp.pad(params["w1"].T, ((0, Dp - D), (0, Fp - F))).astype(bf16)
    b1 = jnp.pad(params["b1"].astype(f32), ((0, 0), (0, Fp - F)))
    w2 = jnp.pad(params["w2"].T, ((0, Fp - F), (0, Dp - D))).astype(bf16)
    b2 = jnp.pad(params["b2"].astype(f32), ((0, 0), (0, Dp - D)))

    # LayerNorm params (zero padding keeps padded output columns at zero).
    g1 = jnp.pad(params["g1"].astype(f32), ((0, 0), (0, Dp - D)))
    be1 = jnp.pad(params["be1"].astype(f32), ((0, 0), (0, Dp - D)))
    g2 = jnp.pad(params["g2"].astype(f32), ((0, 0), (0, Dp - D)))
    be2 = jnp.pad(params["be2"].astype(f32), ((0, 0), (0, Dp - D)))

    kernel = functools.partial(_encoder_layer_kernel,
                               nhead=nhead, d_model=D, head_dim=hd)

    operands = (x, pos_p, wq, wk, wv, bq, bk, bv, wo, bo,
                w1, b1, w2, b2, g1, be1, g2, be2)

    # Per-step VMEM budget: each block is double-buffered by the pipeline; only
    # raise the scoped limit when the defaults would not fit (keeps headroom on
    # v7x where physical VMEM is 64 MiB).
    block_bytes = sum(int(np.prod(a.shape)) * a.dtype.itemsize for a in operands[1:])
    block_bytes += 2 * S * Dp * 4                       # src block + out block
    vmem_est = 2 * block_bytes + 8 * S * max(Dp, Fp) * 4
    vmem_limit = None if vmem_est <= (32 << 20) else int(min(vmem_est, 100 << 20))

    out = pl.pallas_call(
        kernel,
        out_shape=jax.ShapeDtypeStruct((B, S, Dp), f32),
        grid_spec=pltpu.PrefetchScalarGridSpec(
            num_scalar_prefetch=0,
            grid=(B,),
            in_specs=[
                pl.BlockSpec((1, S, Dp), lambda b: (b, 0, 0)),         # src
                pl.BlockSpec((S, Dp), lambda b: (0, 0)),               # pos
                pl.BlockSpec((nhead, Dp, hdp), lambda b: (0, 0, 0)),   # Wq per head
                pl.BlockSpec((nhead, Dp, hdp), lambda b: (0, 0, 0)),   # Wk per head
                pl.BlockSpec((nhead, Dp, hdp), lambda b: (0, 0, 0)),   # Wv per head
                pl.BlockSpec((nhead, 1, hdp), lambda b: (0, 0, 0)),    # bq
                pl.BlockSpec((nhead, 1, hdp), lambda b: (0, 0, 0)),    # bk
                pl.BlockSpec((nhead, 1, hdp), lambda b: (0, 0, 0)),    # bv
                pl.BlockSpec((nhead, hdp, Dp), lambda b: (0, 0, 0)),   # Wo per head
                pl.BlockSpec((1, Dp), lambda b: (0, 0)),               # bo
                pl.BlockSpec((Dp, Fp), lambda b: (0, 0)),              # linear1 W
                pl.BlockSpec((1, Fp), lambda b: (0, 0)),               # linear1 b
                pl.BlockSpec((Fp, Dp), lambda b: (0, 0)),              # linear2 W
                pl.BlockSpec((1, Dp), lambda b: (0, 0)),               # linear2 b
                pl.BlockSpec((1, Dp), lambda b: (0, 0)),               # norm1 gamma
                pl.BlockSpec((1, Dp), lambda b: (0, 0)),               # norm1 beta
                pl.BlockSpec((1, Dp), lambda b: (0, 0)),               # norm2 gamma
                pl.BlockSpec((1, Dp), lambda b: (0, 0)),               # norm2 beta
            ],
            out_specs=pl.BlockSpec((1, S, Dp), lambda b: (b, 0, 0)),
        ),
        compiler_params=pltpu.CompilerParams(
            dimension_semantics=("parallel",),
            vmem_limit_bytes=vmem_limit,
        ),
    )(*operands)

    # Drop feature padding, back to (S, B, D).
    return jnp.transpose(out[:, :, :D], (1, 0, 2))


def reference_forward(src_sbd, pos, params, *, nhead):
    """Pure-JAX f32 reference mirroring the PyTorch forward (eval mode)."""
    S, B, D = src_sbd.shape
    hd = D // nhead
    scale = 1.0 / math.sqrt(hd)

    x = src_sbd
    qk = x + pos[:, None, :]

    wqkv, bqkv = params["wqkv"], params["bqkv"][0]
    q = jnp.einsum("sbd,ed->sbe", qk, wqkv[0:D]) + bqkv[0:D]
    k = jnp.einsum("sbd,ed->sbe", qk, wqkv[D:2 * D]) + bqkv[D:2 * D]
    v = jnp.einsum("sbd,ed->sbe", x, wqkv[2 * D:3 * D]) + bqkv[2 * D:3 * D]

    qh = q.reshape(S, B, nhead, hd) * scale
    kh = k.reshape(S, B, nhead, hd)
    vh = v.reshape(S, B, nhead, hd)
    s = jnp.einsum("sbhe,tbhe->bhst", qh, kh)
    p = jax.nn.softmax(s, axis=-1)
    o = jnp.einsum("bhst,tbhe->sbhe", p, vh).reshape(S, B, D)
    src2 = jnp.einsum("sbd,ed->sbe", o, params["wo"]) + params["bo"][0]

    def ln(y, g, b):
        mu = jnp.mean(y, axis=-1, keepdims=True)
        var = jnp.mean((y - mu) ** 2, axis=-1, keepdims=True)
        return (y - mu) * jax.lax.rsqrt(var + LN_EPS) * g + b

    src1 = ln(x + src2, params["g1"][0], params["be1"][0])
    h1 = jnp.maximum(jnp.einsum("sbd,fd->sbf", src1, params["w1"]) + params["b1"][0], 0.0)
    ff = jnp.einsum("sbf,df->sbd", h1, params["w2"]) + params["b2"][0]
    return ln(src1 + ff, params["g2"][0], params["be2"][0])


if __name__ == "__main__":
    # Small, deterministic configuration.
    S, B, D = 8, 2, 32       # seq, batch, d_model
    NHEAD = 4
    FF = 64                  # dim_feedforward

    key = jax.random.PRNGKey(0)
    ks = jax.random.split(key, 10)

    def rnd(k, shape, scale=0.1):
        return jax.random.normal(k, shape, jnp.float32) * scale

    params = dict(
        wqkv=rnd(ks[0], (3 * D, D)),
        bqkv=rnd(ks[1], (1, 3 * D)),
        wo=rnd(ks[2], (D, D)),
        bo=rnd(ks[3], (1, D)),
        w1=rnd(ks[4], (FF, D)),
        b1=rnd(ks[5], (1, FF)),
        w2=rnd(ks[6], (D, FF)),
        b2=rnd(ks[7], (1, D)),
        g1=jnp.ones((1, D), jnp.float32),
        be1=jnp.zeros((1, D), jnp.float32),
        g2=jnp.ones((1, D), jnp.float32),
        be2=jnp.zeros((1, D), jnp.float32),
    )

    src = jax.random.normal(ks[8], (S, B, D), jnp.float32)
    pos = jax.random.normal(ks[9], (S, D), jnp.float32)

    # TODO(synk): training-mode dropout (stateful RNG masking) is not
    # implemented; eval-mode identity dropout is assumed.
    out = transformer_encoder_layer(src, pos, params, nhead=NHEAD)
    out = jax.block_until_ready(out)

    ref = reference_forward(src, pos, params, nhead=NHEAD)
    np.testing.assert_allclose(np.asarray(out), np.asarray(ref), atol=5e-2, rtol=5e-2)

    print("KERNEL_OK")
</pallas_src>

<mosaic_0001>
module attributes {stable_mosaic.version = 11 : i64} {
  func.func @_encoder_layer_kernel(%arg0: i32, %arg1: memref<1x8x128xf32, #tpu.memory_space<vmem>>, %arg2: memref<8x128xf32, #tpu.memory_space<vmem>>, %arg3: memref<4x128x128xbf16, #tpu.memory_space<vmem>>, %arg4: memref<4x128x128xbf16, #tpu.memory_space<vmem>>, %arg5: memref<4x128x128xbf16, #tpu.memory_space<vmem>>, %arg6: memref<4x1x128xf32, #tpu.memory_space<vmem>>, %arg7: memref<4x1x128xf32, #tpu.memory_space<vmem>>, %arg8: memref<4x1x128xf32, #tpu.memory_space<vmem>>, %arg9: memref<4x128x128xbf16, #tpu.memory_space<vmem>>, %arg10: memref<1x128xf32, #tpu.memory_space<vmem>>, %arg11: memref<128x128xbf16, #tpu.memory_space<vmem>>, %arg12: memref<1x128xf32, #tpu.memory_space<vmem>>, %arg13: memref<128x128xbf16, #tpu.memory_space<vmem>>, %arg14: memref<1x128xf32, #tpu.memory_space<vmem>>, %arg15: memref<1x128xf32, #tpu.memory_space<vmem>>, %arg16: memref<1x128xf32, #tpu.memory_space<vmem>>, %arg17: memref<1x128xf32, #tpu.memory_space<vmem>>, %arg18: memref<1x128xf32, #tpu.memory_space<vmem>>, %arg19: memref<1x8x128xf32, #tpu.memory_space<vmem>>) attributes {dimension_semantics = [#tpu.dimension_semantics<parallel>], iteration_bounds = array<i64: 2>, scalar_prefetch = 0 : i64, scratch_operands = 0 : i64, tpu.core_type = #tpu.core_type<tc>, window_params = [{transform_indices = @transform_0, window_bounds = array<i64: 1, 8, 128>}, {pipeline_mode = #tpu.pipeline_mode<synchronous>, transform_indices = @transform_1, window_bounds = array<i64: 8, 128>}, {pipeline_mode = #tpu.pipeline_mode<synchronous>, transform_indices = @transform_2, window_bounds = array<i64: 4, 128, 128>}, {pipeline_mode = #tpu.pipeline_mode<synchronous>, transform_indices = @transform_3, window_bounds = array<i64: 4, 128, 128>}, {pipeline_mode = #tpu.pipeline_mode<synchronous>, transform_indices = @transform_4, window_bounds = array<i64: 4, 128, 128>}, {pipeline_mode = #tpu.pipeline_mode<synchronous>, transform_indices = @transform_5, window_bounds = array<i64: 4, 1, 128>}, {pipeline_mode = #tpu.pipeline_mode<synchronous>, transform_indices = @transform_6, window_bounds = array<i64: 4, 1, 128>}, {pipeline_mode = #tpu.pipeline_mode<synchronous>, transform_indices = @transform_7, window_bounds = array<i64: 4, 1, 128>}, {pipeline_mode = #tpu.pipeline_mode<synchronous>, transform_indices = @transform_8, window_bounds = array<i64: 4, 128, 128>}, {pipeline_mode = #tpu.pipeline_mode<synchronous>, transform_indices = @transform_9, window_bounds = array<i64: 1, 128>}, {pipeline_mode = #tpu.pipeline_mode<synchronous>, transform_indices = @transform_10, window_bounds = array<i64: 128, 128>}, {pipeline_mode = #tpu.pipeline_mode<synchronous>, transform_indices = @transform_11, window_bounds = array<i64: 1, 128>}, {pipeline_mode = #tpu.pipeline_mode<synchronous>, transform_indices = @transform_12, window_bounds = array<i64: 128, 128>}, {pipeline_mode = #tpu.pipeline_mode<synchronous>, transform_indices = @transform_13, window_bounds = array<i64: 1, 128>}, {pipeline_mode = #tpu.pipeline_mode<synchronous>, transform_indices = @transform_14, window_bounds = array<i64: 1, 128>}, {pipeline_mode = #tpu.pipeline_mode<synchronous>, transform_indices = @transform_15, window_bounds = array<i64: 1, 128>}, {pipeline_mode = #tpu.pipeline_mode<synchronous>, transform_indices = @transform_16, window_bounds = array<i64: 1, 128>}, {pipeline_mode = #tpu.pipeline_mode<synchronous>, transform_indices = @transform_17, window_bounds = array<i64: 1, 128>}, {transform_indices = @transform_18, window_bounds = array<i64: 1, 8, 128>}]} {
    %c0 = arith.constant 0 : index
    %c0_0 = arith.constant 0 : index
    %c0_1 = arith.constant 0 : index
    %0 = vector.load %arg1[%c0, %c0_0, %c0_1] : memref<1x8x128xf32, #tpu.memory_space<vmem>>, vector<1x8x128xf32>
    %1 = vector.shape_cast %0 : vector<1x8x128xf32> to vector<8x128xf32>
    %c0_2 = arith.constant 0 : index
    %c0_3 = arith.constant 0 : index
    %2 = vector.load %arg2[%c0_2, %c0_3] : memref<8x128xf32, #tpu.memory_space<vmem>>, vector<8x128xf32>
    %3 = arith.addf %1, %2 : vector<8x128xf32>
    %4 = arith.truncf %3 : vector<8x128xf32> to vector<8x128xbf16>
    %5 = arith.truncf %1 : vector<8x128xf32> to vector<8x128xbf16>
    %cst = arith.constant 0.000000e+00 : f32
    %6 = vector.broadcast %cst : f32 to vector<8x128xf32>
    %c0_i32 = arith.constant 0 : i32
    %c4_i32 = arith.constant 4 : i32
    %7 = arith.addi %c0_i32, %c4_i32 : i32
    %c1_i32 = arith.constant 1 : i32
    %8 = scf.for %arg20 = %c0_i32 to %7 step %c1_i32 iter_args(%arg21 = %6) -> (vector<8x128xf32>)  : i32 {
      %83 = arith.index_cast %arg20 : i32 to index
      %c0_41 = arith.constant 0 : index
      %c0_42 = arith.constant 0 : index
      %84 = vector.load %arg3[%83, %c0_41, %c0_42] : memref<4x128x128xbf16, #tpu.memory_space<vmem>>, vector<1x128x128xbf16>
      %85 = vector.shape_cast %84 : vector<1x128x128xbf16> to vector<128x128xbf16>
      %cst_43 = arith.constant dense<0.000000e+00> : vector<8x128xf32>
      %86 = tpu.matmul %4, %85, %cst_43 {dimension_numbers = #tpu.dot_dimension_numbers<[1], [0], [0], [1], [0, 0, 1, 1], [], []>} : vector<8x128xbf16>, vector<128x128xbf16>, vector<8x128xf32> -> vector<8x128xf32>
      %87 = arith.index_cast %arg20 : i32 to index
      %c0_44 = arith.constant 0 : index
      %c0_45 = arith.constant 0 : index
      %88 = vector.load %arg6[%87, %c0_44, %c0_45] : memref<4x1x128xf32, #tpu.memory_space<vmem>>, vector<1x1x128xf32>
      %89 = vector.shape_cast %88 : vector<1x1x128xf32> to vector<1x128xf32>
      %90 = vector.broadcast %89 : vector<1x128xf32> to vector<8x128xf32>
      %91 = arith.addf %86, %90 : vector<8x128xf32>
      %92 = arith.index_cast %arg20 : i32 to index
      %c0_46 = arith.constant 0 : index
      %c0_47 = arith.constant 0 : index
      %93 = vector.load %arg4[%92, %c0_46, %c0_47] : memref<4x128x128xbf16, #tpu.memory_space<vmem>>, vector<1x128x128xbf16>
      %94 = vector.shape_cast %93 : vector<1x128x128xbf16> to vector<128x128xbf16>
      %cst_48 = arith.constant dense<0.000000e+00> : vector<8x128xf32>
      %95 = tpu.matmul %4, %94, %cst_48 {dimension_numbers = #tpu.dot_dimension_numbers<[1], [0], [0], [1], [0, 0, 1, 1], [], []>} : vector<8x128xbf16>, vector<128x128xbf16>, vector<8x128xf32> -> vector<8x128xf32>
      %96 = arith.index_cast %arg20 : i32 to index
      %c0_49 = arith.constant 0 : index
      %c0_50 = arith.constant 0 : index
      %97 = vector.load %arg7[%96, %c0_49, %c0_50] : memref<4x1x128xf32, #tpu.memory_space<vmem>>, vector<1x1x128xf32>
      %98 = vector.shape_cast %97 : vector<1x1x128xf32> to vector<1x128xf32>
      %99 = vector.broadcast %98 : vector<1x128xf32> to vector<8x128xf32>
      %100 = arith.addf %95, %99 : vector<8x128xf32>
      %101 = arith.index_cast %arg20 : i32 to index
      %c0_51 = arith.constant 0 : index
      %c0_52 = arith.constant 0 : index
      %102 = vector.load %arg5[%101, %c0_51, %c0_52] : memref<4x128x128xbf16, #tpu.memory_space<vmem>>, vector<1x128x128xbf16>
      %103 = vector.shape_cast %102 : vector<1x128x128xbf16> to vector<128x128xbf16>
      %cst_53 = arith.constant dense<0.000000e+00> : vector<8x128xf32>
      %104 = tpu.matmul %5, %103, %cst_53 {dimension_numbers = #tpu.dot_dimension_numbers<[1], [0], [0], [1], [0, 0, 1, 1], [], []>} : vector<8x128xbf16>, vector<128x128xbf16>, vector<8x128xf32> -> vector<8x128xf32>
      %105 = arith.index_cast %arg20 : i32 to index
      %c0_54 = arith.constant 0 : index
      %c0_55 = arith.constant 0 : index
      %106 = vector.load %arg8[%105, %c0_54, %c0_55] : memref<4x1x128xf32, #tpu.memory_space<vmem>>, vector<1x1x128xf32>
      %107 = vector.shape_cast %106 : vector<1x1x128xf32> to vector<1x128xf32>
      %108 = vector.broadcast %107 : vector<1x128xf32> to vector<8x128xf32>
      %109 = arith.addf %104, %108 : vector<8x128xf32>
      %110 = arith.truncf %91 : vector<8x128xf32> to vector<8x128xbf16>
      %111 = arith.truncf %100 : vector<8x128xf32> to vector<8x128xbf16>
      %cst_56 = arith.constant dense<0.000000e+00> : vector<8x8xf32>
      %112 = tpu.matmul %110, %111, %cst_56 {dimension_numbers = #tpu.dot_dimension_numbers<[1], [1], [0], [0], [0, 0, 1, 0], [], []>} : vector<8x128xbf16>, vector<8x128xbf16>, vector<8x8xf32> -> vector<8x8xf32>
      %cst_57 = arith.constant 0.353553385 : f32
      %113 = vector.broadcast %cst_57 : f32 to vector<8x8xf32>
      %114 = arith.mulf %112, %113 : vector<8x8xf32>
      %cst_58 = arith.constant dense<0xFF800000> : vector<8xf32>
      %115 = vector.multi_reduction <maximumf>, %114, %cst_58 [1] : vector<8x8xf32> to vector<8xf32>
      %116 = vector.shape_cast %115 : vector<8xf32> to vector<8x1xf32>
      %117 = vector.broadcast %116 : vector<8x1xf32> to vector<8x8xf32>
      %118 = arith.subf %114, %117 : vector<8x8xf32>
      %119 = math.exp %118 : vector<8x8xf32>
      %cst_59 = arith.constant dense<0.000000e+00> : vector<8xf32>
      %120 = vector.multi_reduction <add>, %119, %cst_59 [1] : vector<8x8xf32> to vector<8xf32>
      %121 = vector.shape_cast %120 : vector<8xf32> to vector<8x1xf32>
      %122 = tpu.reciprocal %121 {approx = true} : vector<8x1xf32> -> vector<8x1xf32>
      %123 = vector.broadcast %122 : vector<8x1xf32> to vector<8x8xf32>
      %124 = arith.mulf %119, %123 : vector<8x8xf32>
      %125 = arith.truncf %124 : vector<8x8xf32> to vector<8x8xbf16>
      %126 = arith.truncf %109 : vector<8x128xf32> to vector<8x128xbf16>
      %cst_60 = arith.constant dense<0.000000e+00> : vector<8x128xf32>
      %127 = tpu.matmul %125, %126, %cst_60 {dimension_numbers = #tpu.dot_dimension_numbers<[1], [0], [0], [1], [0, 0, 1, 1], [], []>} : vector<8x8xbf16>, vector<8x128xbf16>, vector<8x128xf32> -> vector<8x128xf32>
      %128 = arith.truncf %127 : vector<8x128xf32> to vector<8x128xbf16>
      %129 = arith.index_cast %arg20 : i32 to index
      %c0_61 = arith.constant 0 : index
      %c0_62 = arith.constant 0 : index
      %130 = vector.load %arg9[%129, %c0_61, %c0_62] : memref<4x128x128xbf16, #tpu.memory_space<vmem>>, vector<1x128x128xbf16>
      %131 = vector.shape_cast %130 : vector<1x128x128xbf16> to vector<128x128xbf16>
      %cst_63 = arith.constant dense<0.000000e+00> : vector<8x128xf32>
      %132 = tpu.matmul %128, %131, %cst_63 {dimension_numbers = #tpu.dot_dimension_numbers<[1], [0], [0], [1], [0, 0, 1, 1], [], []>} : vector<8x128xbf16>, vector<128x128xbf16>, vector<8x128xf32> -> vector<8x128xf32>
      %133 = arith.addf %arg21, %132 : vector<8x128xf32>
      scf.yield %133 : vector<8x128xf32>
    }
    %c4_i32_4 = arith.constant 4 : i32
    %c0_5 = arith.constant 0 : index
    %c0_6 = arith.constant 0 : index
    %9 = vector.load %arg10[%c0_5, %c0_6] : memref<1x128xf32, #tpu.memory_space<vmem>>, vector<1x128xf32>
    %10 = vector.broadcast %9 : vector<1x128xf32> to vector<8x128xf32>
    %11 = arith.addf %8, %10 : vector<8x128xf32>
    %12 = arith.addf %1, %11 : vector<8x128xf32>
    %c0_7 = arith.constant 0 : index
    %c0_8 = arith.constant 0 : index
    %13 = vector.load %arg15[%c0_7, %c0_8] : memref<1x128xf32, #tpu.memory_space<vmem>>, vector<1x128xf32>
    %c0_9 = arith.constant 0 : index
    %c0_10 = arith.constant 0 : index
    %14 = vector.load %arg16[%c0_9, %c0_10] : memref<1x128xf32, #tpu.memory_space<vmem>>, vector<1x128xf32>
    %cst_11 = arith.constant dense<0.000000e+00> : vector<8xf32>
    %15 = vector.multi_reduction <add>, %12, %cst_11 [1] : vector<8x128xf32> to vector<8xf32>
    %16 = vector.shape_cast %15 : vector<8xf32> to vector<8x1xf32>
    %cst_12 = arith.constant 3.125000e-02 : f32
    %17 = vector.broadcast %cst_12 : f32 to vector<8x1xf32>
    %18 = arith.mulf %16, %17 : vector<8x1xf32>
    %19 = vector.broadcast %18 : vector<8x1xf32> to vector<8x128xf32>
    %20 = arith.subf %12, %19 : vector<8x128xf32>
    %21 = arith.mulf %20, %20 : vector<8x128xf32>
    %cst_13 = arith.constant dense<0.000000e+00> : vector<8xf32>
    %22 = vector.multi_reduction <add>, %21, %cst_13 [1] : vector<8x128xf32> to vector<8xf32>
    %23 = vector.shape_cast %22 : vector<8xf32> to vector<8x1xf32>
    %24 = arith.mulf %18, %18 : vector<8x1xf32>
    %cst_14 = arith.constant 9.600000e+01 : f32
    %25 = vector.broadcast %cst_14 : f32 to vector<8x1xf32>
    %26 = arith.mulf %25, %24 : vector<8x1xf32>
    %27 = arith.subf %23, %26 : vector<8x1xf32>
    %cst_15 = arith.constant 3.125000e-02 : f32
    %28 = vector.broadcast %cst_15 : f32 to vector<8x1xf32>
    %29 = arith.mulf %27, %28 : vector<8x1xf32>
    %cst_16 = arith.constant 9.99999974E-6 : f32
    %30 = vector.broadcast %cst_16 : f32 to vector<8x1xf32>
    %31 = arith.addf %29, %30 : vector<8x1xf32>
    %32 = math.rsqrt %31 : vector<8x1xf32>
    %33 = vector.broadcast %32 : vector<8x1xf32> to vector<8x128xf32>
    %34 = arith.mulf %20, %33 : vector<8x128xf32>
    %35 = vector.broadcast %13 : vector<1x128xf32> to vector<8x128xf32>
    %36 = arith.mulf %34, %35 : vector<8x128xf32>
    %37 = vector.broadcast %14 : vector<1x128xf32> to vector<8x128xf32>
    %38 = arith.addf %36, %37 : vector<8x128xf32>
    %39 = arith.truncf %38 : vector<8x128xf32> to vector<8x128xbf16>
    %c0_17 = arith.constant 0 : index
    %c0_18 = arith.constant 0 : index
    %40 = vector.load %arg11[%c0_17, %c0_18] : memref<128x128xbf16, #tpu.memory_space<vmem>>, vector<128x128xbf16>
    %cst_19 = arith.constant dense<0.000000e+00> : vector<8x128xf32>
    %41 = tpu.matmul %39, %40, %cst_19 {dimension_numbers = #tpu.dot_dimension_numbers<[1], [0], [0], [1], [0, 0, 1, 1], [], []>} : vector<8x128xbf16>, vector<128x128xbf16>, vector<8x128xf32> -> vector<8x128xf32>
    %c0_20 = arith.constant 0 : index
    %c0_21 = arith.constant 0 : index
    %42 = vector.load %arg12[%c0_20, %c0_21] : memref<1x128xf32, #tpu.memory_space<vmem>>, vector<1x128xf32>
    %43 = vector.broadcast %42 : vector<1x128xf32> to vector<8x128xf32>
    %44 = arith.addf %41, %43 : vector<8x128xf32>
    %cst_22 = arith.constant 0.000000e+00 : f32
    %45 = vector.broadcast %cst_22 : f32 to vector<8x128xf32>
    %46 = arith.maximumf %44, %45 : vector<8x128xf32>
    %47 = arith.truncf %46 : vector<8x128xf32> to vector<8x128xbf16>
    %c0_23 = arith.constant 0 : index
    %c0_24 = arith.constant 0 : index
    %48 = vector.load %arg13[%c0_23, %c0_24] : memref<128x128xbf16, #tpu.memory_space<vmem>>, vector<128x128xbf16>
    %cst_25 = arith.constant dense<0.000000e+00> : vector<8x128xf32>
    %49 = tpu.matmul %47, %48, %cst_25 {dimension_numbers = #tpu.dot_dimension_numbers<[1], [0], [0], [1], [0, 0, 1, 1], [], []>} : vector<8x128xbf16>, vector<128x128xbf16>, vector<8x128xf32> -> vector<8x128xf32>
    %c0_26 = arith.constant 0 : index
    %c0_27 = arith.constant 0 : index
    %50 = vector.load %arg14[%c0_26, %c0_27] : memref<1x128xf32, #tpu.memory_space<vmem>>, vector<1x128xf32>
    %51 = vector.broadcast %50 : vector<1x128xf32> to vector<8x128xf32>
    %52 = arith.addf %49, %51 : vector<8x128xf32>
    %53 = arith.addf %38, %52 : vector<8x128xf32>
    %c0_28 = arith.constant 0 : index
    %c0_29 = arith.constant 0 : index
    %54 = vector.load %arg17[%c0_28, %c0_29] : memref<1x128xf32, #tpu.memory_space<vmem>>, vector<1x128xf32>
    %c0_30 = arith.constant 0 : index
    %c0_31 = arith.constant 0 : index
    %55 = vector.load %arg18[%c0_30, %c0_31] : memref<1x128xf32, #tpu.memory_space<vmem>>, vector<1x128xf32>
    %cst_32 = arith.constant dense<0.000000e+00> : vector<8xf32>
    %56 = vector.multi_reduction <add>, %53, %cst_32 [1] : vector<8x128xf32> to vector<8xf32>
    %57 = vector.shape_cast %56 : vector<8xf32> to vector<8x1xf32>
    %cst_33 = arith.constant 3.125000e-02 : f32
    %58 = vector.broadcast %cst_33 : f32 to vector<8x1xf32>
    %59 = arith.mulf %57, %58 : vector<8x1xf32>
    %60 = vector.broadcast %59 : vector<8x1xf32> to vector<8x128xf32>
    %61 = arith.subf %53, %60 : vector<8x128xf32>
    %62 = arith.mulf %61, %61 : vector<8x128xf32>
    %cst_34 = arith.constant dense<0.000000e+00> : vector<8xf32>
    %63 = vector.multi_reduction <add>, %62, %cst_34 [1] : vector<8x128xf32> to vector<8xf32>
    %64 = vector.shape_cast %63 : vector<8xf32> to vector<8x1xf32>
    %65 = arith.mulf %59, %59 : vector<8x1xf32>
    %cst_35 = arith.constant 9.600000e+01 : f32
    %66 = vector.broadcast %cst_35 : f32 to vector<8x1xf32>
    %67 = arith.mulf %66, %65 : vector<8x1xf32>
    %68 = arith.subf %64, %67 : vector<8x1xf32>
    %cst_36 = arith.constant 3.125000e-02 : f32
    %69 = vector.broadcast %cst_36 : f32 to vector<8x1xf32>
    %70 = arith.mulf %68, %69 : vector<8x1xf32>
    %cst_37 = arith.constant 9.99999974E-6 : f32
    %71 = vector.broadcast %cst_37 : f32 to vector<8x1xf32>
    %72 = arith.addf %70, %71 : vector<8x1xf32>
    %73 = math.rsqrt %72 : vector<8x1xf32>
    %74 = vector.broadcast %73 : vector<8x1xf32> to vector<8x128xf32>
    %75 = arith.mulf %61, %74 : vector<8x128xf32>
    %76 = vector.broadcast %54 : vector<1x128xf32> to vector<8x128xf32>
    %77 = arith.mulf %75, %76 : vector<8x128xf32>
    %78 = vector.broadcast %55 : vector<1x128xf32> to vector<8x128xf32>
    %79 = arith.addf %77, %78 : vector<8x128xf32>
    %c0_38 = arith.constant 0 : index
    %c0_39 = arith.constant 0 : index
    %c0_40 = arith.constant 0 : index
    %80 = vector.load %arg19[%c0_38, %c0_39, %c0_40] : memref<1x8x128xf32, #tpu.memory_space<vmem>>, vector<1x8x128xf32>
    %81 = vector.shape_cast %80 : vector<1x8x128xf32> to vector<8x128xf32>
    %82 = vector.shape_cast %79 : vector<8x128xf32> to vector<1x8x128xf32>
    tpu.vector_store %arg19[%c0_38, %c0_39, %c0_40], %82 {strides = array<i32>} : memref<1x8x128xf32, #tpu.memory_space<vmem>>, vector<1x8x128xf32>,
    return
  }
  func.func @transform_0(%arg0: i32) -> (i32, i32, i32) {
    %c0_i32 = arith.constant 0 : i32
    %c0_i32_0 = arith.constant 0 : i32
    %c0_i32_1 = arith.constant 0 : i32
    return %arg0, %c0_i32, %c0_i32_0 : i32, i32, i32
  }
  func.func @transform_1(%arg0: i32) -> (i32, i32) {
    %c0_i32 = arith.constant 0 : i32
    %c0_i32_0 = arith.constant 0 : i32
    %c0_i32_1 = arith.constant 0 : i32
    return %c0_i32, %c0_i32_0 : i32, i32
  }
  func.func @transform_2(%arg0: i32) -> (i32, i32, i32) {
    %c0_i32 = arith.constant 0 : i32
    %c0_i32_0 = arith.constant 0 : i32
    %c0_i32_1 = arith.constant 0 : i32
    %c0_i32_2 = arith.constant 0 : i32
    return %c0_i32, %c0_i32_0, %c0_i32_1 : i32, i32, i32
  }
  func.func @transform_3(%arg0: i32) -> (i32, i32, i32) {
    %c0_i32 = arith.constant 0 : i32
    %c0_i32_0 = arith.constant 0 : i32
    %c0_i32_1 = arith.constant 0 : i32
    %c0_i32_2 = arith.constant 0 : i32
    return %c0_i32, %c0_i32_0, %c0_i32_1 : i32, i32, i32
  }
  func.func @transform_4(%arg0: i32) -> (i32, i32, i32) {
    %c0_i32 = arith.constant 0 : i32
    %c0_i32_0 = arith.constant 0 : i32
    %c0_i32_1 = arith.constant 0 : i32
    %c0_i32_2 = arith.constant 0 : i32
    return %c0_i32, %c0_i32_0, %c0_i32_1 : i32, i32, i32
  }
  func.func @transform_5(%arg0: i32) -> (i32, i32, i32) {
    %c0_i32 = arith.constant 0 : i32
    %c0_i32_0 = arith.constant 0 : i32
    %c0_i32_1 = arith.constant 0 : i32
    %c0_i32_2 = arith.constant 0 : i32
    return %c0_i32, %c0_i32_0, %c0_i32_1 : i32, i32, i32
  }
  func.func @transform_6(%arg0: i32) -> (i32, i32, i32) {
    %c0_i32 = arith.constant 0 : i32
    %c0_i32_0 = arith.constant 0 : i32
    %c0_i32_1 = arith.constant 0 : i32
    %c0_i32_2 = arith.constant 0 : i32
    return %c0_i32, %c0_i32_0, %c0_i32_1 : i32, i32, i32
  }
  func.func @transform_7(%arg0: i32) -> (i32, i32, i32) {
    %c0_i32 = arith.constant 0 : i32
    %c0_i32_0 = arith.constant 0 : i32
    %c0_i32_1 = arith.constant 0 : i32
    %c0_i32_2 = arith.constant 0 : i32
    return %c0_i32, %c0_i32_0, %c0_i32_1 : i32, i32, i32
  }
  func.func @transform_8(%arg0: i32) -> (i32, i32, i32) {
    %c0_i32 = arith.constant 0 : i32
    %c0_i32_0 = arith.constant 0 : i32
    %c0_i32_1 = arith.constant 0 : i32
    %c0_i32_2 = arith.constant 0 : i32
    return %c0_i32, %c0_i32_0, %c0_i32_1 : i32, i32, i32
  }
  func.func @transform_9(%arg0: i32) -> (i32, i32) {
    %c0_i32 = arith.constant 0 : i32
    %c0_i32_0 = arith.constant 0 : i32
    %c0_i32_1 = arith.constant 0 : i32
    return %c0_i32, %c0_i32_0 : i32, i32
  }
  func.func @transform_10(%arg0: i32) -> (i32, i32) {
    %c0_i32 = arith.constant 0 : i32
    %c0_i32_0 = arith.constant 0 : i32
    %c0_i32_1 = arith.constant 0 : i32
    return %c0_i32, %c0_i32_0 : i32, i32
  }
  func.func @transform_11(%arg0: i32) -> (i32, i32) {
    %c0_i32 = arith.constant 0 : i32
    %c0_i32_0 = arith.constant 0 : i32
    %c0_i32_1 = arith.constant 0 : i32
    return %c0_i32, %c0_i32_0 : i32, i32
  }
  func.func @transform_12(%arg0: i32) -> (i32, i32) {
    %c0_i32 = arith.constant 0 : i32
    %c0_i32_0 = arith.constant 0 : i32
    %c0_i32_1 = arith.constant 0 : i32
    return %c0_i32, %c0_i32_0 : i32, i32
  }
  func.func @transform_13(%arg0: i32) -> (i32, i32) {
    %c0_i32 = arith.constant 0 : i32
    %c0_i32_0 = arith.constant 0 : i32
    %c0_i32_1 = arith.constant 0 : i32
    return %c0_i32, %c0_i32_0 : i32, i32
  }
  func.func @transform_14(%arg0: i32) -> (i32, i32) {
    %c0_i32 = arith.constant 0 : i32
    %c0_i32_0 = arith.constant 0 : i32
    %c0_i32_1 = arith.constant 0 : i32
    return %c0_i32, %c0_i32_0 : i32, i32
  }
  func.func @transform_15(%arg0: i32) -> (i32, i32) {
    %c0_i32 = arith.constant 0 : i32
    %c0_i32_0 = arith.constant 0 : i32
    %c0_i32_1 = arith.constant 0 : i32
    return %c0_i32, %c0_i32_0 : i32, i32
  }
  func.func @transform_16(%arg0: i32) -> (i32, i32) {
    %c0_i32 = arith.constant 0 : i32
    %c0_i32_0 = arith.constant 0 : i32
    %c0_i32_1 = arith.constant 0 : i32
    return %c0_i32, %c0_i32_0 : i32, i32
  }
  func.func @transform_17(%arg0: i32) -> (i32, i32) {
    %c0_i32 = arith.constant 0 : i32
    %c0_i32_0 = arith.constant 0 : i32
    %c0_i32_1 = arith.constant 0 : i32
    return %c0_i32, %c0_i32_0 : i32, i32
  }
  func.func @transform_18(%arg0: i32) -> (i32, i32, i32) {
    %c0_i32 = arith.constant 0 : i32
    %c0_i32_0 = arith.constant 0 : i32
    %c0_i32_1 = arith.constant 0 : i32
    return %arg0, %c0_i32, %c0_i32_0 : i32, i32, i32
  }
}

</mosaic_0001>

<bundles_post_ra>
// kernel: tpu_custom_call.1
= control target key start
LH: loop header
LB: loop body
LE: loop exit
PB: predicated region body
PF: predicated region fallthrough
CT: control target
= control target key end

     0   :  { %s2828_s0 = inlined_call_operand.hbm [shape: f32[2,8,128], index: 0, kind: input, shape index: {}]   ;;  %s2829_s1 = inlined_call_operand.hbm [shape: f32[8,128], index: 1, kind: input, shape index: {}]   ;;  %s2830_s2 = inlined_call_operand.hbm [shape: bf16[4,128,128], index: 2, kind: input, shape index: {}]   ;;  %s2831_s3 = inlined_call_operand.hbm [shape: bf16[4,128,128], index: 3, kind: input, shape index: {}]   ;;  %s2832_s4 = inlined_call_operand.hbm [shape: bf16[4,128,128], index: 4, kind: input, shape index: {}]   ;;  %s2833_s5 = inlined_call_operand.vmem [shape: f32[4,1,128], index: 5, kind: input, shape index: {}]   ;;  %s2834_s6 = inlined_call_operand.hbm [shape: f32[4,1,128], index: 6, kind: input, shape index: {}]   ;;  %s2835_s7 = inlined_call_operand.hbm [shape: f32[4,1,128], index: 7, kind: input, shape index: {}]   ;;  %s2836_s8 = inlined_call_operand.hbm [shape: bf16[4,128,128], index: 8, kind: input, shape index: {}]   ;;  %s2837_s9 = inlined_call_operand.vmem [shape: f32[1,128], index: 9, kind: input, shape index: {}]   ;;  %s2838_s10 = inlined_call_operand.hbm [shape: bf16[128,128], index: 10, kind: input, shape index: {}]   ;;  %s2839_s11 = inlined_call_operand.vmem [shape: f32[1,128], index: 11, kind: input, shape index: {}]   ;;  %s2840_s12 = inlined_call_operand.hbm [shape: bf16[128,128], index: 12, kind: input, shape index: {}]   ;;  %s2841_s13 = inlined_call_operand.vmem [shape: f32[1,128], index: 13, kind: input, shape index: {}]   ;;  %s2842_s14 = inlined_call_operand.vmem [shape: f32[1,128], index: 14, kind: input, shape index: {}]   ;;  %s2843_s15 = inlined_call_operand.vmem [shape: f32[1,128], index: 15, kind: input, shape index: {}]   ;;  %s2844_s16 = inlined_call_operand.vmem [shape: f32[1,128], index: 16, kind: input, shape index: {}]   ;;  %s2845_s17 = inlined_call_operand.vmem [shape: f32[1,128], index: 17, kind: input, shape index: {}]   ;;  %s2846_s18 = inlined_call_operand.hbm [shape: f32[2,8,128], index: 18, kind: output, shape index: {}]  }
   0x1   :  { %2849 = sst [smem:[#allocation27_spill]] %s2828_s0 }
   0x2   :  { %2850 = sst [smem:[#allocation28_spill]] %s2829_s1 }
   0x3   :  { %2851 = sst [smem:[#allocation29_spill]] %s2830_s2 }
   0x4   :  { %2852 = sst [smem:[#allocation30_spill]] %s2831_s3 }
   0x5   :  { %2853 = sst [smem:[#allocation31_spill]] %s2832_s4 }
   0x6   :  { %2854 = sst [smem:[#allocation32_spill]] %s2834_s6 }
   0x7   :  { %2855 = sst [smem:[#allocation33_spill]] %s2835_s7 }
   0x8   :  { %2856 = sst [smem:[#allocation34_spill]] %s2836_s8 }
   0x9   :  { %2857 = sst [smem:[#allocation35_spill]] %s2839_s11 }
   0xa   :  { %2858 = sst [smem:[#allocation36_spill]] %s2841_s13 }
   0xb   :  { %2859 = sst [smem:[#allocation37_spill]] %s2844_s16 }
   0xc   :  { %2860 = sst [smem:[#allocation38_spill]] %s2845_s17 }
   0xd   :  { %2861 = sst [smem:[#allocation39_spill]] %s2846_s18 }
   0xe   :  { %23 = vsyncpa [#allocation3], 0 }
   0xf   :  { %25 = vsyncpa [#allocation3 + $0x1], 0 }
  0x10   :  { %26 = vsyncpa [#allocation6], 0 }
  0x11   :  { %27 = vsyncpa [#allocation9], 0 }
  0x12   :  { %28 = vsyncpa [#allocation12], 0 }
  0x13   :  { %29 = vsyncpa [#allocation15], 0 }
  0x14   :  { %30 = vsyncpa [#allocation18], 0 }
  0x15   :  { %31 = vsyncpa [#allocation4], 0 }
  0x16   :  { %33 = vsyncpa [#allocation4 + $0x1], 0  ;;  %s2534_s27 = smov 0   ;;  %s2536_s28 = smov 0  }
  0x17   :  { %s2538_s29 = smov 0   ;;  %s2540_s30 = smov 0  }
  0x18 LB: > { %s2862_s1 = sld [smem:[#allocation28_spill]]  ;;  %s2558_s21 = sadd.s32 4294967295, %s2416_s30   ;;  %s2416_s30 = sphi %s2540_s30, %s2886_s30   ;;  %s2412_s29 = sphi %s2538_s29, %s2885_s29   ;;  %s2408_s28 = sphi %s2536_s28, %s2884_s28   ;;  %s2404_s27 = sphi %s2534_s27, %s2883_s27  }
  0x19   : > { %p1568_p0 = scmp.ge.s32.totalorder %s2416_s30, 1  ;;  %p60_p1 = scmp.eq.s32.totalorder %s2558_s21, 0 }
  0x1a   : > { %p453_p2 = scmp.lt.s32.totalorder %s2416_s30, 3  ;;  %s2426_s2 = smov [#allocation5]  }
  0x1b   : > { %s467_s23 = sshll.u32 %s2426_s2, 4  ;;  %s2864_s3 = sld [smem:[#allocation30_spill]]  ;;  %s468_s23 = int_to_ptr.vmem [resolvable:$true] %s467_s23 }
  0x1c   : > { %p2563_p3 = pnand %p1568_p0, %p453_p2  ;;  %s2866_s6 = sld [smem:[#allocation32_spill]] }
  0x1d   : > { %s2427_s17 = smov [#allocation8]   ;;  %s2428_s24 = smov 64  }
  0x1e   : > { %s465_s20 = sshll.u32 %s2862_s1, 4  ;;  %p1887_p5 = pneg %p2563_p3  ;;  %s466_s20 = int_to_ptr.hbm [resolvable:$true] %s465_s20 }
  0x1f   : > { %s492_s18 = sshll.u32 %s2427_s17, 4  ;;  %s2429_s25 = smov 4   ;;  %s493_s18 = int_to_ptr.vmem [resolvable:$true] %s492_s18 }
  0x20   : > { %p2575_p6 = pnand %p1887_p5, %p60_p1  ;;  %s2867_s8 = sld [smem:[#allocation34_spill]] }
  0x21   : > { %s490_s26 = sshll.u32 %s2864_s3, 4  ;;  %s2430_s3 = smov [#allocation11]   ;;  %s491_s26 = int_to_ptr.hbm [resolvable:$true] %s490_s26 }
  0x22   : > { %s521_s2 = sshll.u32 %s2866_s6, 4  ;;  %s523_s16 = sshll.u32 %s2430_s3, 4  ;;  %s522_s2 = int_to_ptr.hbm [resolvable:$true] %s521_s2  ;;  %s524_s16 = int_to_ptr.vmem [resolvable:$true] %s523_s16 }
  0x23   : > { %1890 = dma.hbm_to_vmem [thread:$0]  (!%p2575_p6), %s466_s20, 128, %s468_s23, [#allocation6]  }
  0x24   : > { %1896 = dma.hbm_to_vmem [thread:$0]  (!%p2575_p6), %s491_s26, 4096, %s493_s18, [#allocation9], %s2428_s24, %s2428_s24, %s2429_s25  }
  0x25   : > { %s2431_s17 = smov 16   ;;  %s2432_s20 = smov 1  }
  0x26   : > { %s549_s6 = sshll.u32 %s2867_s8, 4  ;;  %s2433_s23 = smov [#allocation14]   ;;  %s550_s6 = int_to_ptr.hbm [resolvable:$true] %s549_s6 }
  0x27   : > { %1902 = dma.hbm_to_vmem [thread:$0]  (!%p2575_p6), %s522_s2, 64, %s524_s16, [#allocation12], %s2431_s17, %s2431_s17, %s2432_s20  }
  0x28   : > { %s551_s13 = sshll.u32 %s2433_s23, 4  ;;  %s2868_s26 = sld [smem:[#allocation29_spill]]  ;;  %s552_s13 = int_to_ptr.vmem [resolvable:$true] %s551_s13 }
  0x29   : > { %1908 = dma.hbm_to_vmem [thread:$0]  (!%p2575_p6), %s550_s6, 4096, %s552_s13, [#allocation15], %s2428_s24, %s2428_s24, %s2429_s25  }
  0x2a   : > { %s2869_s4 = sld [smem:[#allocation31_spill]]  ;;  %s2434_s16 = smov [#allocation7]  }
  0x2b   : > { %s478_s2 = sshll.u32 %s2434_s16, 4  ;;  %s2435_s11 = smov [#allocation10]   ;;  %s479_s2 = int_to_ptr.vmem [resolvable:$true] %s478_s2 }
  0x2c   : > { %s506_s23 = sshll.u32 %s2435_s11, 4  ;;  %s2870_s7 = sld [smem:[#allocation33_spill]]  ;;  %s507_s23 = int_to_ptr.vmem [resolvable:$true] %s506_s23 }
  0x2d   : > { %s566_s1 = sshll.u32 %s2838_s10, 4  ;;  %s583_s18 = sshll.u32 %s2840_s12, 4  ;;  %s567_s1 = int_to_ptr.hbm [resolvable:$true] %s566_s1  ;;  %s584_s18 = int_to_ptr.hbm [resolvable:$true] %s583_s18 }
  0x2e   : > { %s476_s3 = sshll.u32 %s2868_s26, 4  ;;  %s1567_s26 = sadd.s32 4294967294, %s2416_s30   ;;  %s477_s3 = int_to_ptr.hbm [resolvable:$true] %s476_s3 }
  0x2f   : > { %1893 = dma.hbm_to_vmem [thread:$0]  (!%p2575_p6), %s477_s3, 4096, %s479_s2, [#allocation6], %s2428_s24, %s2428_s24, %s2429_s25  }
  0x30   : > { %s504_s8 = sshll.u32 %s2869_s4, 4  ;;  %s2436_s3 = smov [#allocation13]   ;;  %s505_s8 = int_to_ptr.hbm [resolvable:$true] %s504_s8 }
  0x31   : > { %1899 = dma.hbm_to_vmem [thread:$0]  (!%p2575_p6), %s505_s8, 4096, %s507_s23, [#allocation9], %s2428_s24, %s2428_s24, %s2429_s25  }
  0x32   : > { %s535_s6 = sshll.u32 %s2870_s7, 4  ;;  %s537_s16 = sshll.u32 %s2436_s3, 4  ;;  %s536_s6 = int_to_ptr.hbm [resolvable:$true] %s535_s6  ;;  %s538_s16 = int_to_ptr.vmem [resolvable:$true] %s537_s16 }
  0x33   : > { %1905 = dma.hbm_to_vmem [thread:$0]  (!%p2575_p6), %s536_s6, 64, %s538_s16, [#allocation12], %s2431_s17, %s2431_s17, %s2432_s20  }
  0x34   : > { %s2437_s8 = smov [#allocation16]   ;;  %s2438_s17 = smov [#allocation17]  }
  0x35   : > { %s568_s2 = sshll.u32 %s2437_s8, 4  ;;  %s585_s20 = sshll.u32 %s2438_s17, 4  ;;  %s569_s2 = int_to_ptr.vmem [resolvable:$true] %s568_s2  ;;  %s586_s20 = int_to_ptr.vmem [resolvable:$true] %s585_s20 }
  0x36   : > { %1911 = dma.hbm_to_vmem [thread:$0]  (!%p2575_p6), %s567_s1, 1024, %s569_s2, [#allocation15], %s2428_s24, %s2428_s24, %s2429_s25  }
  0x37   : > { %1914 = dma.hbm_to_vmem [thread:$0]  (!%p2575_p6), %s584_s18, 1024, %s586_s20, [#allocation18], %s2428_s24, %s2428_s24, %s2429_s25  }
  0x38   : > { %s2644_s6 = sadd.s32 1, %s2416_s30   ;;  %s46_s13 = sadd.s32 1, %s2412_s29 }
  0x39   : > { %s43_s19 = ssub.s32 %s2416_s30, %s2644_s6  ;;  %p53_p7 = scmp.ne.s32.totalorder %s2412_s29, %s2408_s28 }
  0x3a   : > { %p44_p8 = scmp.eq.s32.totalorder %s43_s19, 0  ;;  %p54_p9 = scmp.eq.s32.totalorder %s2416_s30, 0 }
  0x3b   : > { %p59_p10 = scmp.ne.s32.totalorder %s2408_s28, %s2404_s27  ;;  %p440_p11 = scmp.eq.s32.totalorder %s2558_s21, 1 }
  0x3c   : > { %s2656_s1 = scalar_select %p44_p8, %s2412_s29, %s46_s13  }
  0x3d   : > { %p2660_p12 = por %p60_p1, %p59_p10  ;;  %p2664_p13 = por %p440_p11, %p53_p7 }
  0x3e   : > { %p446_p0 = scmp.eq.s32.totalorder %s1567_s26, 1  ;;  %p55_p2 = por %p54_p9, %p53_p7 }
  0x3f   : > { %s614_s25 = sand.u32 1, %s2412_s29   ;;  %p1932_p6 = scmp.lt.s32.totalorder %s2416_s30, 2 }
  0x40   : > { %p2669_p5 = por %p446_p0, %p59_p10  ;;  %s1579_s16 = sshll.u32 %s614_s25, 3 }
  0x41   : > { %s1580_s8 = sshll.u32 %s2416_s30, 3  ;;  %s2874_s23 = sld [smem:[#allocation27_spill]] }
  0x42   : > { %s618_s20 = scalar_lea.vmem [#allocation2], %s1579_s16  ;;  %p2678_p8 = pnand %p1932_p6, %p55_p2 }
  0x43   : > { %s626_s13 = sshll.u32 %s618_s20, 4  ;;  %s615_s19 = scalar_lea.sflag [#allocation3], %s614_s25  ;;  %s627_s13 = int_to_ptr.vmem [resolvable:$true] %s626_s13 }
  0x44   : > { %p2296_p9 = pneg %p2678_p8 }
  0x47   : > { %s622_s18 = scalar_lea.hbm %s2874_s23, %s1580_s8  ;;  %s2299_s16 = scalar_lea.hbm %s2874_s23, 16 }
  0x48   : > { %s624_s17 = sshll.u32 %s622_s18, 4  ;;  %s625_s17 = int_to_ptr.hbm [resolvable:$true] %s624_s17 }
  0x49   : > { %s2292_s4 = sshra.s32 %s625_s17, 4  ;;  %s2293_s4 = int_to_ptr.hbm [resolvable:$true] %s2292_s4 }
  0x4a   : > { %s2294_s7 = scalar_lea.hbm %s2293_s4, 8  ;;  %p2300_p0 = scmp.lt.s32.totalorder %s2293_s4, %s2874_s23 }
  0x4b   : > { %p2295_p7 = scmp.ne.s32.totalorder %s2293_s4, %s2294_s7  ;;  %p2301_p2 = scmp.lt.s32.totalorder %s2299_s16, %s2294_s7 }
  0x4d   : > { %p2297_p10 = pnand %p2296_p9, %p2295_p7  ;;  %p2302_p6 = por %p2301_p2, %p2300_p0 }
  0x4f   : > { %p2298_p11 = pneg %p2297_p10 }
  0x51   : > { %p2303_p4 = pnand %p2302_p6, %p2298_p11 }
  0x53   : > { %2306 = shalt.err (!%p2303_p4)
}
  0x54   : > { %1918 = dma.hbm_to_vmem [thread:$0]  (!%p2678_p8), %s625_s17, 128, %s627_s13, %s615_s19  }
  0x55   : > { %635 = sbr.rel (%p2563_p3) target bundleno = 1735 (0x6c7), region = 92  ;;  %s2695_s25 = sand.u32 (!%p2563_p3), 1, %s2408_s28  }
  0x56   : > { %s1582_s20 = sshll.u32 (!%p2563_p3), %s2695_s25, 3  ;;  %s638_s8 = scalar_lea.sflag (!%p2563_p3), [#allocation3], %s2695_s25 }
  0x57   : > { %s641_s2 = scalar_lea.vmem (!%p2563_p3), [#allocation2], %s1582_s20 }
  0x5a   : > { %2375 = dma.done.wait (%p2660_p12), %s638_s8, 128  }
  0x5b   : > { %2377 = vsyncadd (%p2660_p12), %s638_s8, 4294967168 }
  0x5c   : > { %2379 = dma.done.wait (%p60_p1), [#allocation6], 4224  }
  0x5d   : > { %2381 = vsyncadd (%p60_p1), [#allocation6], 4294963072 }
  0x5e   : > { %2383 = dma.done.wait (%p60_p1), [#allocation9], 8192  }
  0x5f   : > { %2385 = vsyncadd (%p60_p1), [#allocation9], 4294959104 }
  0x60   : > { %2387 = dma.done.wait (%p60_p1), [#allocation12], 128  }
  0x61   : > { %2389 = vsyncadd (%p60_p1), [#allocation12], 4294967168 }
  0x62   : > { %2391 = dma.done.wait (%p60_p1), [#allocation15], 5120  }
  0x63   : > { %2393 = vsyncadd (%p60_p1), [#allocation15], 4294962176 }
  0x64   : > { %2395 = dma.done.wait (%p60_p1), [#allocation18], 1024  }
  0x65   : > { %2397 = vsyncadd (%p60_p1), [#allocation18], 4294966272  ;;  %v2723_v0 = vld [vmem:[%s641_s2] sm:$0xff]  ;;  %v742_v1 = vld [vmem:[#allocation5] sm:$0xff]  ;;  %s2730_s4 = scalar_lea.vmem [#allocation19], %s1582_s20  ;;  %v2732_v5 = vmov 0.0  }
  0x66   : > { %v743_v2 = vadd.f32 %v742_v1, %v2723_v0  ;;  %v745_v3 = vpack.c.bf16 %v2723_v0, %v2723_v0  ;;  %s2734_s7 = smov 0  }
  0x68   : > { %v2728_v4 = vpack.c.bf16 %v743_v2, %v743_v2 }
  0x69 LB: >> { %s2743_s22 = sshll.u32 %s2424_s7, 6  ;;  %s856_s0 = scalar_lea.vmem [#allocation11], %s2424_s7  ;;  %vm1022_vm0 = vcmask 64512   ;;  %vm1039_vm1 = vcmask 1043456   ;;  %s2424_s7 = sphi %s2734_s7, %s751_s7   ;;  %v2420_v5 = vphi %v2732_v5, %v2876_v5  }
  0x6a   : >> { %s839_s17 = scalar_lea.vmem [#allocation8], %s2743_s22  ;;  %s755_s13 = scalar_lea.vmem [#allocation7], %s2743_s22  ;;  %v2004_v22 = vld [vmem:[%s856_s0] ss:$0 sm:$0xff] }
  0x6b   : >> { %v1812_v6 = vld [vmem:[%s839_s17 + $0x38] sm:$0xff]  ;;  %v1811_v8 = vld [vmem:[%s839_s17 + $0x30] sm:$0xff]  ;;  %v1810_v10 = vld [vmem:[%s839_s17 + $0x28] sm:$0xff]  ;;  %s772_s16 = scalar_lea.vmem %s2833_s5, %s2424_s7  ;;  %s923_s11 = scalar_lea.vmem [#allocation10], %s2743_s22 }
  0x6c   : >> { %v1803_v7 = vld [vmem:[%s755_s13 + $0x38] sm:$0xff]  ;;  %909 = vmatpush.bf16.msra.mxu1 %v1812_v6  ;;  %v1802_v9 = vld [vmem:[%s755_s13 + $0x30] sm:$0xff]  ;;  %v1801_v11 = vld [vmem:[%s755_s13 + $0x28] sm:$0xff]  ;;  %s940_s18 = scalar_lea.vmem [#allocation13], %s2424_s7  ;;  %s1058_s20 = scalar_lea.vmem [#allocation14], %s2743_s22 }
  0x6d   : >> { %825 = vmatpush.bf16.msra.mxu0 %v1803_v7  ;;  %v1809_v12 = vld [vmem:[%s839_s17 + $0x20] sm:$0xff]  ;;  %v1808_v14 = vld [vmem:[%s839_s17 + $0x18] sm:$0xff]  ;;  %v1807_v16 = vld [vmem:[%s839_s17 + $0x10] sm:$0xff]  ;;  %s751_s7 = sadd.s32 1, %s2424_s7  }
  0x6e   : >> { %v1800_v13 = vld [vmem:[%s755_s13 + $0x20] sm:$0xff]  ;;  %v1799_v15 = vld [vmem:[%s755_s13 + $0x18] sm:$0xff]  ;;  %v1798_v17 = vld [vmem:[%s755_s13 + $0x10] sm:$0xff]  ;;  %p748_p1 = scmp.ge.s32.totalorder %s751_s7, 4  }
  0x6f   : >> { %v1806_v18 = vld [vmem:[%s839_s17 + $0x8] sm:$0xff]  ;;  %v1805_v20 = vld [vmem:[%s839_s17] sm:$0xff]  ;;  %v1821_v32 = vld [vmem:[%s923_s11 + $0x38] sm:$0xff]  ;;  %s2877_s19 = sld [smem:[#allocation35_spill]] (%p748_p1) }
  0x70   : >> { %910 = vmatpush.bf16.msra.mxu1 %v1811_v8  ;;  %v1797_v19 = vld [vmem:[%s755_s13 + $0x8] sm:$0xff]  ;;  %v1796_v21 = vld [vmem:[%s755_s13] sm:$0xff]  ;;  %993 = vmatpush.bf16.msra.mxu2 %v1821_v32  ;;  %v1820_v33 = vld [vmem:[%s923_s11 + $0x30] sm:$0xff]  ;;  %s2879_s7 = sld [smem:[#allocation37_spill]] (%p748_p1) }
  0x71   : >> { %826 = vmatpush.bf16.msra.mxu0 %v1802_v9  ;;  %v2005_v24 = vld [vmem:[%s772_s16] ss:$0 sm:$0xff]  ;;  %v1819_v34 = vld [vmem:[%s923_s11 + $0x28] sm:$0xff]  ;;  %v1817_v36 = vld [vmem:[%s923_s11 + $0x18] sm:$0xff]  ;;  %s2880_s17 = sld [smem:[#allocation39_spill]] (%p748_p1) }
  0x72   : >> { %v1818_v35 = vld [vmem:[%s923_s11 + $0x20] sm:$0xff]  ;;  %v1816_v37 = vld [vmem:[%s923_s11 + $0x10] sm:$0xff]  ;;  %v1815_v38 = vld [vmem:[%s923_s11 + $0x8] sm:$0xff]  ;;  %s2881_s16 = sld [smem:[#allocation38_spill]] (%p748_p1) }
  0x73   : >> { %v1814_v41 = vld [vmem:[%s923_s11] sm:$0xff]  ;;  %v1830_v55 = vld [vmem:[%s1058_s20 + $0x38] sm:$0xff]  ;;  %v1829_v56 = vld [vmem:[%s1058_s20 + $0x30] sm:$0xff] }
  0x74   : >> { %911 = vmatpush.bf16.msra.mxu1 %v1810_v10  ;;  %994 = vmatpush.bf16.msra.mxu2 %v1820_v33  ;;  %v2006_v50 = vld [vmem:[%s940_s18] ss:$0 sm:$0xff]  ;;  %v1828_v57 = vld [vmem:[%s1058_s20 + $0x28] sm:$0xff]  ;;  %v1826_v59 = vld [vmem:[%s1058_s20 + $0x18] sm:$0xff]  ;;  %s2878_s18 = sld [smem:[#allocation36_spill]] (%p748_p1) }
  0x75   : >> { %827 = vmatpush.bf16.msra.mxu0 %v1801_v11  ;;  %v1827_v58 = vld [vmem:[%s1058_s20 + $0x20] sm:$0xff]  ;;  %v1825_v60 = vld [vmem:[%s1058_s20 + $0x10] sm:$0xff]  ;;  %v1824_v62 = vld [vmem:[%s1058_s20 + $0x8] sm:$0xff] }
  0x76   : >> { %v1823_v6 = vld [vmem:[%s1058_s20] sm:$0xff]  ;;  %v1844_v32 = vld [vmem:[#allocation17 + $0x28] sm:$0xff] (%p748_p1)  ;;  %s1792_s20 = sshll.u32 (%p748_p1), %s2558_s21, 3  ;;  %s1389_s21 = sshll.u32 (%p748_p1), %s2730_s4, 4  ;;  %s1390_s21 = int_to_ptr.vmem [resolvable:$true] %s1389_s21 }
  0x77   : > { %v1843_v33 = vld [vmem:[#allocation17 + $0x20] sm:$0xff] (%p748_p1)  ;;  %s1387_s13 = scalar_lea.hbm (%p748_p1), %s2880_s17, %s1792_s20  ;;  %s2342_s22 = scalar_lea.hbm (%p748_p1), %s2880_s17, 16 }
  0x78   : >> { %912 = vmatpush.bf16.msra.mxu1 %v1809_v12  ;;  %995 = vmatpush.bf16.msra.mxu2 %v1819_v34  ;;  %s1391_s11 = sshll.u32 (%p748_p1), %s1387_s13, 4  ;;  %s1392_s11 = int_to_ptr.hbm [resolvable:$true] %s1391_s11 }
  0x79   : >> { %828 = vmatpush.bf16.msra.mxu0 %v1800_v13  ;;  %v2011_v13 = vld [vmem:[%s2837_s9] ss:$0 sm:$0xff] (%p748_p1)  ;;  %s2336_s8 = sshra.s32 (%p748_p1), %s1392_s11, 4  ;;  %s2337_s8 = int_to_ptr.hbm [resolvable:$true] %s2336_s8 }
  0x7a   : > { %s2338_s2 = scalar_lea.hbm (%p748_p1), %s2337_s8, 8  ;;  %p2343_p8 = scmp.lt.s32.totalorder (%p748_p1), %s2337_s8, %s2880_s17 }
  0x7b   : > { %p2339_p3 = scmp.ne.s32.totalorder (%p748_p1), %s2337_s8, %s2338_s2  ;;  %p2344_p7 = scmp.lt.s32.totalorder (%p748_p1), %s2342_s22, %s2338_s2 }
  0x7c   : >> { %913 = vmatpush.bf16.msra.mxu1 %v1808_v14  ;;  %996 = vmatpush.bf16.msra.mxu2 %v1818_v35 }
  0x7d   : >> { %829 = vmatpush.bf16.msra.mxu0 %v1799_v15  ;;  %p2340_p4 = pnand (%p748_p1), %p2339_p3, %p2664_p13  ;;  %p2345_p9 = por (%p748_p1), %p2344_p7, %p2343_p8 }
  0x7f   : > { %p2341_p12 = pneg (%p748_p1), %p2340_p4 }
  0x80   : >> { %914 = vmatpush.bf16.msra.mxu1 %v1807_v16  ;;  %997 = vmatpush.bf16.msra.mxu2 %v1817_v36  ;;  %v1842_v36 = vld [vmem:[#allocation17 + $0x18] sm:$0xff] (%p748_p1) }
  0x81   : >> { %830 = vmatpush.bf16.msra.mxu0 %v1798_v17  ;;  %p2346_p10 = pnand (%p748_p1), %p2345_p9, %p2341_p12 }
  0x84   : >> { %915 = vmatpush.bf16.msra.mxu1 %v1806_v18  ;;  %998 = vmatpush.bf16.msra.mxu2 %v1816_v37 }
  0x85   : >> { %831 = vmatpush.bf16.msra.mxu0 %v1797_v19  ;;  %v1838_v19 = vld [vmem:[#allocation16 + $0x38] sm:$0xff] (%p748_p1) }
  0x88   : >> { %916 = vmatpush.bf16.msra.mxu1 %v1805_v20  ;;  %999 = vmatpush.bf16.msra.mxu2 %v1815_v38  ;;  %v1837_v20 = vld [vmem:[#allocation16 + $0x30] sm:$0xff] (%p748_p1) }
  0x89   : >> { %832 = vmatpush.bf16.msra.mxu0 %v1796_v21  ;;  %v1836_v21 = vld [vmem:[#allocation16 + $0x28] sm:$0xff] (%p748_p1) }
  0x8b   : >> { %917 = vmatmul.bf16.vlgmr.msra.gmra.mxu1 %v2728_v4 }
  0x8c   : >> { %833 = vmatmul.bf16.vlgmr.msra.gmra.mxu0 %v2728_v4  ;;  %1000 = vmatpush.bf16.msra.mxu2 %v1814_v41  ;;  %v1833_v4 = vld [vmem:[#allocation16 + $0x10] sm:$0xff] (%p748_p1) }
  0x8f   : >> { %1001 = vmatmul.bf16.vlgmr.msra.gmra.mxu2 %v745_v3  ;;  %v1834_v3 = vld [vmem:[#allocation16 + $0x18] sm:$0xff] (%p748_p1) }
 0x108   : >> { %v918_v23 = vpop.f32.mrf.mxu1 }
 0x109   : >> { %v834_v25 = vpop.f32.mrf.mxu0  ;;  %v919_v26 = vadd.f32 %v2004_v22, %v918_v23  ;;  %v1835_v22 = vld [vmem:[#allocation16 + $0x20] sm:$0xff] (%p748_p1)  ;;  %v1832_v23 = vld [vmem:[#allocation16 + $0x8] sm:$0xff] (%p748_p1) }
 0x10a   : >> { %v835_v28 = vadd.f32 %v2005_v24, %v834_v25 }
 0x10b   : >> { %v1007_v27 = vpack.c.bf16 %v919_v26, %v919_v26 }
 0x10c   : >> { %v1006_v29 = vpack.c.bf16 %v835_v28, %v835_v28  ;;  %v1846_v28 = vld [vmem:[#allocation17 + $0x38] sm:$0xff] (%p748_p1) }
 0x10d   : >> { %1015 = vmatpush.bf16.xpose.msrb.mxu0 %v1007_v27  ;;  %1328 = vmatpush.bf16.msra.mxu1 (%p748_p1), %v1846_v28 }
 0x110   : >> { %v920_v30 = vpop.f32.mrf.mxu1 }
 0x111   : >> { %v836_v31 = vpop.f32.mrf.mxu0  ;;  %v1845_v30 = vld [vmem:[#allocation17 + $0x30] sm:$0xff] (%p748_p1) }
 0x112   : >> { %v1002_v49 = vpop.f32.mrf.mxu2  ;;  %1329 = vmatpush.bf16.msra.mxu1 (%p748_p1), %v1845_v30 }
 0x113   : >> { %v1003_v51 = vadd.f32 %v2006_v50, %v1002_v49  ;;  %v1840_v49 = vld [vmem:[#allocation17 + $0x8] sm:$0xff] (%p748_p1)  ;;  %v1839_v50 = vld [vmem:[#allocation17] sm:$0xff] (%p748_p1) }
 0x114   : >> { %1016 = vmatmul.bf16.vlgmr.msrb.gmra.mxu0 %v1006_v29 }
 0x115   : >> { %v1035_v53 = vpack.c.bf16 %v1003_v51, %v1003_v51  ;;  %1245 = vmatpush.bf16.msra.mxu0 (%p748_p1), %v1838_v19  ;;  %v2014_v51 = vld [vmem:[%s2877_s19] ss:$0 sm:$0xff] (%p748_p1) }
 0x116   : > { %1330 = vmatpush.bf16.msra.mxu1 (%p748_p1), %v1844_v32 }
 0x117   : >> { %v1041_v54 = vsel %vm1039_vm1, %v1035_v53, 0 }
 0x118   : >> { %1050 = vmatpush.bf16.msra.mxu3 %v1041_v54 }
 0x119   : > { %1246 = vmatpush.bf16.msra.mxu0 (%p748_p1), %v1837_v20  ;;  %v2017_v20 = vld [vmem:[%s2881_s16] ss:$0 sm:$0xff] (%p748_p1) }
 0x11a   : >> { %v1004_v52 = vpop.f32.mrf.mxu2  ;;  %1331 = vmatpush.bf16.msra.mxu1 (%p748_p1), %v1843_v33 }
 0x11c   : >> { %1123 = vmatpush.bf16.msrb.mxu3 %v1830_v55 }
 0x11d   : > { %1247 = vmatpush.bf16.msra.mxu0 (%p748_p1), %v1836_v21 }
 0x11e   : > { %1332 = vmatpush.bf16.msra.mxu1 (%p748_p1), %v1842_v36 }
 0x120   : >> { %1124 = vmatpush.bf16.msrb.mxu3 %v1829_v56 }
 0x121   : > { %1248 = vmatpush.bf16.msra.mxu0 (%p748_p1), %v1835_v22 }
 0x124   : >> { %1125 = vmatpush.bf16.msrb.mxu3 %v1828_v57  ;;  %v2015_v57 = vld [vmem:[%s2878_s18] ss:$0 sm:$0xff] (%p748_p1)  ;;  %s1377_s18 = scalar_lea.sflag (%p748_p1), [#allocation4], %s2695_s25 }
 0x125   : > { %1249 = vmatpush.bf16.msra.mxu0 (%p748_p1), %v1834_v3 }
 0x128   : >> { %1126 = vmatpush.bf16.msrb.mxu3 %v1827_v58 }
 0x129   : > { %1250 = vmatpush.bf16.msra.mxu0 (%p748_p1), %v1833_v4 }
 0x12c   : >> { %1127 = vmatpush.bf16.msrb.mxu3 %v1826_v59 }
 0x12d   : > { %1251 = vmatpush.bf16.msra.mxu0 (%p748_p1), %v1832_v23 }
 0x130   : >> { %1128 = vmatpush.bf16.msrb.mxu3 %v1825_v60 }
 0x134   : >> { %1129 = vmatpush.bf16.msrb.mxu3 %v1824_v62 }
 0x138   : >> { %1130 = vmatpush.bf16.msrb.mxu3 %v1823_v6 }
 0x191   : >> { %v1017_v39 = vpop.f32.mrf.mxu0 }
 0x192   : >> { %v1021_v40 = vmul.f32 0.35355338, %v1017_v39  ;;  %v1841_v39 = vld [vmem:[#allocation17 + $0x10] sm:$0xff] (%p748_p1) }
 0x193   : > { %1333 = vmatpush.bf16.msra.mxu1 (%p748_p1), %v1841_v39 }
 0x194   : >> { %v1023_v42 = vsel %vm1022_vm0, %v1021_v40, -inf }
 0x195   : >> { %1024 = vmax.xlane.f32.xlu0 %v1023_v42  ;;  %v2012_v42 = vld [vmem:[%s2842_s14] ss:$0 sm:$0xff] (%p748_p1) }
 0x197   : > { %1334 = vmatpush.bf16.msra.mxu1 (%p748_p1), %v1840_v49 }
 0x199   : >> { %v1019_v43 = vpop.f32.mrf.mxu0 }
 0x19b   : > { %1335 = vmatpush.bf16.msra.mxu1 (%p748_p1), %v1839_v50 }
 0x208   : >> { %v1025_v44 = vpop.xlane.xlu0 %1024 }
 0x209   : >> { %v1026_v45 = vsub.f32 %v1021_v40, %v1025_v44 }
 0x20b   : >> { %v1027_v46 = vmul.f32 1.442695, %v1026_v45  ;;  %v2013_v45 = vld [vmem:[%s2843_s15] ss:$0 sm:$0xff] (%p748_p1) }
 0x20d   : >> { %2007 = vpow2.f32 %v1027_v46 }
 0x213   : >> { %v2008_v47 = vpop.eup %2007 }
 0x214   : >> { %v1029_v48 = vsel %vm1022_vm0, %v2008_v47, 0.0 }
 0x215   : >> { %1030 = vadd.xlane.f32.xlu0 %v1029_v48 }
 0x288   : >> { %v1031_v61 = vpop.xlane.xlu0 %1030 }
 0x289   : >> { %2009 = vrcp.f32 %v1031_v61 }
 0x28f   : >> { %v2010_v63 = vpop.eup %2009 }
 0x290   : >> { %v1033_v1 = vmul.f32 %v2010_v63, %v2008_v47 }
 0x292   : >> { %v1034_v2 = vpack.c.bf16 %v1033_v1, %v1033_v1 }
 0x294   : >> { %1693 = vmatmul.msk.bf16.vlgmr.msra.gmra.mxu3 %vm1022_vm0, %v1034_v2 }
 0x317   : >> { %v1052_v7 = vpop.f32.mrf.mxu3 }
 0x318   : >> { %v1056_v8 = vpack.c.bf16 %v1052_v7, %v1052_v7 }
 0x31a   : >> { %1131 = vmatmul.bf16.vlgmr.msrb.gmra.mxu3 %v1056_v8 }
 0x31f   : >> { %v1054_v9 = vpop.f32.mrf.mxu3 }
 0x39d   : >> { %v1132_v10 = vpop.f32.mrf.mxu3 }
 0x39e   : >> { %v1136_v11 = vadd.f32 %v2420_v5, %v1132_v10  }
 0x3a0   : >> { %v2876_v5 = vmov %v1136_v11  ;;  %v1141_v14 = vadd.f32 (%p748_p1), %v2011_v13, %v1136_v11 }
 0x3a1   : > { %750 = sbr.rel (!%p748_p1) target bundleno = 105 (0x69), region = 187 }
 0x3a2   : > { %v1142_v15 = vadd.f32 (%p748_p1), %v1141_v14, %v2723_v0  ;;  %v1831_v0 = vld [vmem:[#allocation16] sm:$0xff] (%p748_p1) }
 0x3a3   : > { %1252 = vmatpush.bf16.msra.mxu0 (%p748_p1), %v1831_v0 }
 0x3a4   : > { %1145 = vadd.xlane.f32.xlu0 (%p748_p1), %v1142_v15 }
 0x3a5   : >> { %v1134_v12 = vpop.f32.mrf.mxu3 }
 0x417   : > { %v1146_v16 = vpop.xlane.xlu0 %1145 }
 0x418   : > { %v1147_v17 = vmul.f32 0.03125, %v1146_v16 }
 0x41a   : > { %v1148_v5 = vsub.f32 %v1142_v15, %v1147_v17  ;;  %v1152_v24 = vmul.f32 %v1147_v17, %v1147_v17 }
 0x41c   : > { %v1149_v18 = vmul.f32 %v1148_v5, %v1148_v5  ;;  %v1153_v25 = vmul.f32 96.0, %v1152_v24 }
 0x41e   : > { %1150 = vadd.xlane.f32.xlu0 %v1149_v18 }
 0x491   : > { %v1151_v26 = vpop.xlane.xlu0 %1150 }
 0x492   : > { %v1154_v27 = vsub.f32 %v1151_v26, %v1153_v25 }
 0x494   : > { %v1155_v29 = vmul.f32 0.03125, %v1154_v27 }
 0x496   : > { %v1156_v31 = vadd.f32 1e-05, %v1155_v29 }
 0x498   : > { %2018 = vrsqrt.f32 %v1156_v31  ;;  %vm1163_vm3 = vweird.f32 %v1156_v31 }
 0x49e   : > { %v2019_v34 = vpop.eup %2018 }
 0x49f   : > { %v1158_v35 = vmul.f32 %v2019_v34, %v1156_v31  ;;  %vm1164_vm2 = vweird.f32 %v2019_v34 }
 0x4a0   : > { %vm1165_vm4 = vmor %vm1163_vm3, %vm1164_vm2 }
 0x4a1   : > { %v1159_v37 = vmul.f32 %v2019_v34, %v1158_v35 }
 0x4a3   : > { %v1160_v38 = vmul.f32 0.5, %v1159_v37 }
 0x4a5   : > { %v1161_v40 = vsub.f32 1.5, %v1160_v38 }
 0x4a7   : > { %v1162_v41 = vmul.f32 %v2019_v34, %v1161_v40 }
 0x4a9   : > { %v1166_v43 = vsel %vm1165_vm4, %v2019_v34, %v1162_v41 }
 0x4aa   : > { %v1167_v44 = vmul.f32 %v1166_v43, %v1148_v5  ;;  %v2016_v5 = vld [vmem:[%s2879_s7] ss:$0 sm:$0xff] }
 0x4ac   : > { %v1171_v46 = vmul.f32 %v2012_v42, %v1167_v44 }
 0x4ae   : > { %v1175_v47 = vadd.f32 %v2013_v45, %v1171_v46 }
 0x4b0   : > { %v1176_v48 = vpack.c.bf16 %v1175_v47, %v1175_v47 }
 0x4b2   : > { %1253 = vmatmul.bf16.vlgmr.msra.gmra.mxu0 %v1176_v48 }
 0x52f   : > { %v1254_v52 = vpop.f32.mrf.mxu0 }
 0x530   : > { %v1255_v53 = vadd.f32 %v2014_v51, %v1254_v52 }
 0x532   : > { %v1258_v54 = vmax.f32 %v1255_v53, 0.0 }
 0x534   : > { %v1259_v55 = vpack.c.bf16 %v1258_v54, %v1258_v54 }
 0x536   : > { %1336 = vmatmul.bf16.vlgmr.msra.gmra.mxu1 %v1259_v55 }
 0x537   : > { %v1256_v56 = vpop.f32.mrf.mxu0 }
 0x5b3   : > { %v1337_v58 = vpop.f32.mrf.mxu1 }
 0x5b4   : > { %v1338_v59 = vadd.f32 %v2015_v57, %v1337_v58 }
 0x5b6   : > { %v1341_v60 = vadd.f32 %v1338_v59, %v1175_v47 }
 0x5b8   : > { %1344 = vadd.xlane.f32.xlu1 %v1341_v60 }
 0x5bb   : > { %v1339_v61 = vpop.f32.mrf.mxu1 }
 0x62b   : > { %v1345_v62 = vpop.xlane.xlu1 %1344 }
 0x62c   : > { %v1346_v63 = vmul.f32 0.03125, %v1345_v62 }
 0x62e   : > { %v1347_v1 = vsub.f32 %v1341_v60, %v1346_v63  ;;  %v1351_v6 = vmul.f32 %v1346_v63, %v1346_v63 }
 0x630   : > { %v1348_v2 = vmul.f32 %v1347_v1, %v1347_v1  ;;  %v1352_v7 = vmul.f32 96.0, %v1351_v6 }
 0x632   : > { %1349 = vadd.xlane.f32.xlu1 %v1348_v2 }
 0x6a5   : > { %v1350_v8 = vpop.xlane.xlu1 %1349 }
 0x6a6   : > { %v1353_v9 = vsub.f32 %v1350_v8, %v1352_v7 }
 0x6a8   : > { %v1354_v10 = vmul.f32 0.03125, %v1353_v9 }
 0x6aa   : > { %v1355_v11 = vadd.f32 1e-05, %v1354_v10 }
 0x6ac   : > { %2020 = vrsqrt.f32 %v1355_v11  ;;  %vm1362_vm6 = vweird.f32 %v1355_v11 }
 0x6b2   : > { %v2021_v12 = vpop.eup %2020 }
 0x6b3   : > { %v1357_v13 = vmul.f32 %v2021_v12, %v1355_v11  ;;  %vm1363_vm5 = vweird.f32 %v2021_v12 }
 0x6b4   : > { %vm1364_vm7 = vmor %vm1362_vm6, %vm1363_vm5 }
 0x6b5   : > { %v1358_v14 = vmul.f32 %v2021_v12, %v1357_v13 }
 0x6b7   : > { %v1359_v15 = vmul.f32 0.5, %v1358_v14 }
 0x6b9   : > { %v1360_v16 = vsub.f32 1.5, %v1359_v15 }
 0x6bb   : > { %v1361_v17 = vmul.f32 %v2021_v12, %v1360_v16 }
 0x6bd   : > { %v1365_v18 = vsel %vm1364_vm7, %v2021_v12, %v1361_v17 }
 0x6be   : > { %v1366_v19 = vmul.f32 %v1365_v18, %v1347_v1 }
 0x6c0   : > { %v1370_v21 = vmul.f32 %v2016_v5, %v1366_v19 }
 0x6c2   : > { %v1374_v22 = vadd.f32 %v2017_v20, %v1370_v21 }
 0x6c4   : > { %1375 = vst [vmem:[%s2730_s4] sm:$0xff] %v1374_v22 }
 0x6c5   : > { %2349 = shalt.err (!%p2346_p10)
}
 0x6c6   : > { %1885 = dma.vmem_to_hbm [thread:$0]  (%p2664_p13), %s1390_s21, 128, %s1392_s11, %s1377_s18  }
 0x6c7 PF: > { %s1403_s25 = sand.u32 1, %s2404_s27   ;;  %p2882_p11 = scmp.ge.s32.totalorder %s2416_s30, 2 }
 0x6c8   : > { %s1404_s4 = scalar_lea.sflag [#allocation4], %s1403_s25 }
 0x6c9   : > { %p1920_p0 = pnand %p2882_p11, %p2669_p5 }
 0x6cb   : > { %p1921_p2 = pneg %p1920_p0 }
 0x6cd   : > { %2399 = dma.done.wait (%p1921_p2), %s1404_s4, 128  }
 0x6ce   : > { %2401 = vsyncadd (%p1921_p2), %s1404_s4, 4294967168  ;;  %p36_p6 = scmp.ge.s32.totalorder %s2644_s6, 4   ;;  %s2883_s27 = smov %s2408_s28 }
 0x6cf   : > { %s2884_s28 = smov %s2412_s29  ;;  %s2885_s29 = smov %s2656_s1 }
 0x6d0   : > { %s2886_s30 = smov %s2644_s6  ;;  %38 = sbr.rel (!%p36_p6) target bundleno = 24 (0x18), region = 198 }
 0x6d5   :  { %1410 = vsyncpa [#allocation3], 1 }
 0x6d6   :  { %1412 = vsyncpa [#allocation3 + $0x1], 1 }
 0x6d7   :  { %1413 = vsyncpa [#allocation6], 1 }
 0x6d8   :  { %1414 = vsyncpa [#allocation9], 1 }
 0x6d9   :  { %1415 = vsyncpa [#allocation12], 1 }
 0x6da   :  { %1416 = vsyncpa [#allocation15], 1 }
 0x6db   :  { %1417 = vsyncpa [#allocation18], 1 }
 0x6dc   :  { %1418 = vsyncpa [#allocation4], 1 }
 0x6dd   :  { %1420 = vsyncpa [#allocation4 + $0x1], 1 }

</bundles_post_ra>
